<compile_context>
chip_gen: v5e
topology: v5e:2x2
jax: 0.10.0
libtpu: 0.0.40
codegen_flags: <defaults>
</compile_context>

<pallas_src>
import jax
import jax.numpy as jnp
import numpy as np
from jax.experimental import pallas as pl
from jax.experimental.pallas import tpu as pltpu

LANES = 128  # common lane width for the packed slab / lane-dense outputs


def _round_up(n, m):
    return ((n + m - 1) // m) * m


def low_level_rnn_forward(x, h, params, rollout):
    """Pallas equivalent of LowLevelRNN.forward(x, h).

    x: (1, rollout, input_size) float32
    h: (hidden_size,) float32
    Returns (output (rollout, output_size), h_final (hidden_size,)).
    """
    Wx_X, Wh_h, Wh_y, bh, by = (params["Wx_X"], params["Wh_h"],
                                params["Wh_y"], params["bh"], params["by"])
    x_dim, h_dim = Wx_X.shape
    y_dim = Wh_y.shape[1]
    assert max(x_dim, h_dim, y_dim) <= LANES, "pad width exceeded"

    # ---- pack everything into one lane-dense slab (single HBM->VMEM DMA) ---
    # Sections (all 128 lanes wide, zero padded, 8-sublane aligned starts):
    #   [o_x   : o_x  +R_PAD )  x         (rollout rows used)
    #   [o_wxx : o_wxx+LANES )  Wx_X      (contraction padded to 128 rows)
    #   [o_whh : o_whh+LANES )  Wh_h
    #   [o_why : o_why+LANES )  Wh_y
    #   row o_vec    : bh
    #   row o_vec+1  : by
    #   row o_vec+2  : h0
    r_pad = _round_up(rollout, 8)
    o_x = 0
    o_wxx = o_x + r_pad
    o_whh = o_wxx + LANES
    o_why = o_whh + LANES
    o_vec = o_why + LANES
    n_rows = o_vec + 8

    slab = jnp.zeros((n_rows, LANES), jnp.float32)
    slab = slab.at[o_x:o_x + rollout, :x_dim].set(x[0].astype(jnp.float32))
    slab = slab.at[o_wxx:o_wxx + x_dim, :h_dim].set(Wx_X.astype(jnp.float32))
    slab = slab.at[o_whh:o_whh + h_dim, :h_dim].set(Wh_h.astype(jnp.float32))
    slab = slab.at[o_why:o_why + h_dim, :y_dim].set(Wh_y.astype(jnp.float32))
    slab = slab.at[o_vec, :h_dim].set(bh.astype(jnp.float32))
    slab = slab.at[o_vec + 1, :y_dim].set(by.astype(jnp.float32))
    slab = slab.at[o_vec + 2, :h_dim].set(h.astype(jnp.float32))

    def kernel(slab_ref, out_ref, hout_ref):
        # Hoisted input projection for all timesteps (one MXU pass).
        xw = (jnp.dot(slab_ref[o_x:o_x + rollout, :],
                      slab_ref[o_wxx:o_wxx + LANES, :],
                      preferred_element_type=jnp.float32)
              + slab_ref[o_vec:o_vec + 1, :])                 # (rollout, 128)

        whh = slab_ref[o_whh:o_whh + LANES, :]                # (128, 128)
        h_carry = slab_ref[o_vec + 2:o_vec + 3, :]            # (1, 128)

        # Fully unrolled recurrence; hidden state lives in vregs only.
        hs = []
        for i in range(rollout):
            pre = xw[i:i + 1, :] + jnp.dot(h_carry, whh,
                                           preferred_element_type=jnp.float32)
            h_carry = jnp.tanh(pre)                           # (1, 128)
            hs.append(h_carry)

        h_all = jnp.concatenate(hs, axis=0)                   # (rollout, 128)

        # Batched output projection + lane-dense full-block stores.
        y_all = (jnp.dot(h_all, slab_ref[o_why:o_why + LANES, :],
                         preferred_element_type=jnp.float32)
                 + slab_ref[o_vec + 1:o_vec + 2, :])          # (rollout, 128)
        out_ref[...] = y_all.astype(out_ref.dtype)
        hout_ref[...] = h_carry.astype(hout_ref.dtype)

    vmem = pl.BlockSpec(memory_space=pltpu.MemorySpace.VMEM)
    out_p, h_p = pl.pallas_call(
        kernel,
        out_shape=(
            jax.ShapeDtypeStruct((rollout, LANES), jnp.float32),
            jax.ShapeDtypeStruct((1, LANES), jnp.float32),
        ),
        in_specs=[vmem],
        out_specs=(vmem, vmem),
    )(slab)

    # Drop the zero-padded lanes outside the kernel.
    return out_p[:, :y_dim], h_p[0, :h_dim]


def init_params(key, input_size, hidden_size, output_size):
    k1, k2, k3 = jax.random.split(key, 3)
    return {
        "Wx_X": jax.random.normal(k1, (input_size, hidden_size), jnp.float32) * 0.01,
        "Wh_h": jax.random.normal(k2, (hidden_size, hidden_size), jnp.float32) * 0.01,
        "Wh_y": jax.random.normal(k3, (hidden_size, output_size), jnp.float32) * 0.01,
        "bh": jnp.zeros((hidden_size,), jnp.float32),
        "by": jnp.zeros((output_size,), jnp.float32),
    }


def reference_forward(x, h, params, rollout):
    """Pure-JAX reference reproducing the PyTorch loop semantics."""
    outs = []
    for i in range(rollout):
        pre = x[0, i] @ params["Wx_X"] + h @ params["Wh_h"] + params["bh"]
        h = jnp.tanh(pre)
        y = h @ params["Wh_y"] + params["by"]
        outs.append(y)
    return jnp.stack(outs, axis=0), h


if __name__ == "__main__":
    input_size, hidden_size, output_size = 16, 32, 8
    rollout = 8
    # n_layers is unused in the PyTorch forward; omitted here.

    key = jax.random.PRNGKey(0)
    kp, kx = jax.random.split(key)
    params = init_params(kp, input_size, hidden_size, output_size)

    x = jax.random.normal(kx, (1, rollout, input_size), jnp.float32)
    h0 = jnp.zeros((hidden_size,), jnp.float32)   # init_hidden()

    out, h_final = low_level_rnn_forward(x, h0, params, rollout)
    out = jax.block_until_ready(out)
    h_final = jax.block_until_ready(h_final)

    ref_out, ref_h = reference_forward(x, h0, params, rollout)
    assert out.shape == (rollout, output_size)
    assert h_final.shape == (hidden_size,)
    np.testing.assert_allclose(np.asarray(out), np.asarray(ref_out),
                               rtol=1e-5, atol=1e-5)
    np.testing.assert_allclose(np.asarray(h_final), np.asarray(ref_h),
                               rtol=1e-5, atol=1e-5)
    print("KERNEL_OK")
</pallas_src>

<mosaic_0001>
module attributes {stable_mosaic.version = 11 : i64} {
  func.func @kernel(%arg0: memref<400x128xf32, #tpu.memory_space<vmem>>, %arg1: memref<8x128xf32, #tpu.memory_space<vmem>>, %arg2: memref<1x128xf32, #tpu.memory_space<vmem>>) attributes {dimension_semantics = [], scalar_prefetch = 0 : i64, scratch_operands = 0 : i64, tpu.core_type = #tpu.core_type<tc>} {
    %c0 = arith.constant 0 : index
    %c0_0 = arith.constant 0 : index
    %0 = vector.load %arg0[%c0, %c0_0] : memref<400x128xf32, #tpu.memory_space<vmem>>, vector<8x128xf32>
    %c8 = arith.constant 8 : index
    %c0_1 = arith.constant 0 : index
    %1 = vector.load %arg0[%c8, %c0_1] : memref<400x128xf32, #tpu.memory_space<vmem>>, vector<128x128xf32>
    %cst = arith.constant dense<0.000000e+00> : vector<8x128xf32>
    %2 = tpu.matmul %0, %1, %cst {dimension_numbers = #tpu.dot_dimension_numbers<[1], [0], [0], [1], [0, 0, 1, 1], [], []>} : vector<8x128xf32>, vector<128x128xf32>, vector<8x128xf32> -> vector<8x128xf32>
    %c392 = arith.constant 392 : index
    %c0_2 = arith.constant 0 : index
    %3 = vector.load %arg0[%c392, %c0_2] : memref<400x128xf32, #tpu.memory_space<vmem>>, vector<1x128xf32>
    %4 = vector.broadcast %3 : vector<1x128xf32> to vector<8x128xf32>
    %5 = arith.addf %2, %4 : vector<8x128xf32>
    %c136 = arith.constant 136 : index
    %c0_3 = arith.constant 0 : index
    %6 = vector.load %arg0[%c136, %c0_3] : memref<400x128xf32, #tpu.memory_space<vmem>>, vector<128x128xf32>
    %c394 = arith.constant 394 : index
    %c0_4 = arith.constant 0 : index
    %7 = vector.load %arg0[%c394, %c0_4] : memref<400x128xf32, #tpu.memory_space<vmem>>, vector<1x128xf32>
    %8 = vector.extract_strided_slice %5 {offsets = [0, 0], sizes = [1, 128], strides = [1, 1]} : vector<8x128xf32> to vector<1x128xf32>
    %cst_5 = arith.constant dense<0.000000e+00> : vector<1x128xf32>
    %9 = tpu.matmul %7, %6, %cst_5 {dimension_numbers = #tpu.dot_dimension_numbers<[1], [0], [0], [1], [0, 0, 1, 1], [], []>} : vector<1x128xf32>, vector<128x128xf32>, vector<1x128xf32> -> vector<1x128xf32>
    %10 = arith.addf %8, %9 : vector<1x128xf32>
    %11 = math.tanh %10 : vector<1x128xf32>
    %12 = vector.extract_strided_slice %5 {offsets = [1, 0], sizes = [1, 128], strides = [1, 1]} : vector<8x128xf32> to vector<1x128xf32>
    %cst_6 = arith.constant dense<0.000000e+00> : vector<1x128xf32>
    %13 = tpu.matmul %11, %6, %cst_6 {dimension_numbers = #tpu.dot_dimension_numbers<[1], [0], [0], [1], [0, 0, 1, 1], [], []>} : vector<1x128xf32>, vector<128x128xf32>, vector<1x128xf32> -> vector<1x128xf32>
    %14 = arith.addf %12, %13 : vector<1x128xf32>
    %15 = math.tanh %14 : vector<1x128xf32>
    %16 = vector.extract_strided_slice %5 {offsets = [2, 0], sizes = [1, 128], strides = [1, 1]} : vector<8x128xf32> to vector<1x128xf32>
    %cst_7 = arith.constant dense<0.000000e+00> : vector<1x128xf32>
    %17 = tpu.matmul %15, %6, %cst_7 {dimension_numbers = #tpu.dot_dimension_numbers<[1], [0], [0], [1], [0, 0, 1, 1], [], []>} : vector<1x128xf32>, vector<128x128xf32>, vector<1x128xf32> -> vector<1x128xf32>
    %18 = arith.addf %16, %17 : vector<1x128xf32>
    %19 = math.tanh %18 : vector<1x128xf32>
    %20 = vector.extract_strided_slice %5 {offsets = [3, 0], sizes = [1, 128], strides = [1, 1]} : vector<8x128xf32> to vector<1x128xf32>
    %cst_8 = arith.constant dense<0.000000e+00> : vector<1x128xf32>
    %21 = tpu.matmul %19, %6, %cst_8 {dimension_numbers = #tpu.dot_dimension_numbers<[1], [0], [0], [1], [0, 0, 1, 1], [], []>} : vector<1x128xf32>, vector<128x128xf32>, vector<1x128xf32> -> vector<1x128xf32>
    %22 = arith.addf %20, %21 : vector<1x128xf32>
    %23 = math.tanh %22 : vector<1x128xf32>
    %24 = vector.extract_strided_slice %5 {offsets = [4, 0], sizes = [1, 128], strides = [1, 1]} : vector<8x128xf32> to vector<1x128xf32>
    %cst_9 = arith.constant dense<0.000000e+00> : vector<1x128xf32>
    %25 = tpu.matmul %23, %6, %cst_9 {dimension_numbers = #tpu.dot_dimension_numbers<[1], [0], [0], [1], [0, 0, 1, 1], [], []>} : vector<1x128xf32>, vector<128x128xf32>, vector<1x128xf32> -> vector<1x128xf32>
    %26 = arith.addf %24, %25 : vector<1x128xf32>
    %27 = math.tanh %26 : vector<1x128xf32>
    %28 = vector.extract_strided_slice %5 {offsets = [5, 0], sizes = [1, 128], strides = [1, 1]} : vector<8x128xf32> to vector<1x128xf32>
    %cst_10 = arith.constant dense<0.000000e+00> : vector<1x128xf32>
    %29 = tpu.matmul %27, %6, %cst_10 {dimension_numbers = #tpu.dot_dimension_numbers<[1], [0], [0], [1], [0, 0, 1, 1], [], []>} : vector<1x128xf32>, vector<128x128xf32>, vector<1x128xf32> -> vector<1x128xf32>
    %30 = arith.addf %28, %29 : vector<1x128xf32>
    %31 = math.tanh %30 : vector<1x128xf32>
    %32 = vector.extract_strided_slice %5 {offsets = [6, 0], sizes = [1, 128], strides = [1, 1]} : vector<8x128xf32> to vector<1x128xf32>
    %cst_11 = arith.constant dense<0.000000e+00> : vector<1x128xf32>
    %33 = tpu.matmul %31, %6, %cst_11 {dimension_numbers = #tpu.dot_dimension_numbers<[1], [0], [0], [1], [0, 0, 1, 1], [], []>} : vector<1x128xf32>, vector<128x128xf32>, vector<1x128xf32> -> vector<1x128xf32>
    %34 = arith.addf %32, %33 : vector<1x128xf32>
    %35 = math.tanh %34 : vector<1x128xf32>
    %36 = vector.extract_strided_slice %5 {offsets = [7, 0], sizes = [1, 128], strides = [1, 1]} : vector<8x128xf32> to vector<1x128xf32>
    %cst_12 = arith.constant dense<0.000000e+00> : vector<1x128xf32>
    %37 = tpu.matmul %35, %6, %cst_12 {dimension_numbers = #tpu.dot_dimension_numbers<[1], [0], [0], [1], [0, 0, 1, 1], [], []>} : vector<1x128xf32>, vector<128x128xf32>, vector<1x128xf32> -> vector<1x128xf32>
    %38 = arith.addf %36, %37 : vector<1x128xf32>
    %39 = math.tanh %38 : vector<1x128xf32>
    %40 = tpu.concatenate %11, %15, %19, %23, %27, %31, %35, %39 in 0 : vector<1x128xf32>, vector<1x128xf32>, vector<1x128xf32>, vector<1x128xf32>, vector<1x128xf32>, vector<1x128xf32>, vector<1x128xf32>, vector<1x128xf32> -> vector<8x128xf32>
    %c264 = arith.constant 264 : index
    %c0_13 = arith.constant 0 : index
    %41 = vector.load %arg0[%c264, %c0_13] : memref<400x128xf32, #tpu.memory_space<vmem>>, vector<128x128xf32>
    %cst_14 = arith.constant dense<0.000000e+00> : vector<8x128xf32>
    %42 = tpu.matmul %40, %41, %cst_14 {dimension_numbers = #tpu.dot_dimension_numbers<[1], [0], [0], [1], [0, 0, 1, 1], [], []>} : vector<8x128xf32>, vector<128x128xf32>, vector<8x128xf32> -> vector<8x128xf32>
    %c393 = arith.constant 393 : index
    %c0_15 = arith.constant 0 : index
    %43 = vector.load %arg0[%c393, %c0_15] : memref<400x128xf32, #tpu.memory_space<vmem>>, vector<1x128xf32>
    %44 = vector.broadcast %43 : vector<1x128xf32> to vector<8x128xf32>
    %45 = arith.addf %42, %44 : vector<8x128xf32>
    %c0_16 = arith.constant 0 : index
    %c0_17 = arith.constant 0 : index
    %46 = vector.load %arg1[%c0_16, %c0_17] : memref<8x128xf32, #tpu.memory_space<vmem>>, vector<8x128xf32>
    tpu.vector_store %arg1[%c0_16, %c0_17], %45 {strides = array<i32>} : memref<8x128xf32, #tpu.memory_space<vmem>>, vector<8x128xf32>,
    %c0_18 = arith.constant 0 : index
    %c0_19 = arith.constant 0 : index
    %47 = vector.load %arg2[%c0_18, %c0_19] : memref<1x128xf32, #tpu.memory_space<vmem>>, vector<1x128xf32>
    tpu.vector_store %arg2[%c0_18, %c0_19], %39 {strides = array<i32>} : memref<1x128xf32, #tpu.memory_space<vmem>>, vector<1x128xf32>,
    return
  }
}

</mosaic_0001>

<bundles_post_ra>
// kernel: tpu_custom_call.1
= control target key start
LH: loop header
LB: loop body
LE: loop exit
PB: predicated region body
PF: predicated region fallthrough
CT: control target
= control target key end

     0   :  { %8 = vsyncpa [#allocation3], 0  ;;  %s686_s0 = inlined_call_operand.hbm [shape: f32[400,128], index: 0, kind: input, shape index: {}]   ;;  %s687_s1 = inlined_call_operand.hbm [shape: f32[8,128], index: 1, kind: output, shape index: {0}]   ;;  %s688_s2 = inlined_call_operand.hbm [shape: f32[1,128], index: 2, kind: output, shape index: {1}]  }
   0x1   :  { %9 = vsyncpa [#allocation4], 0 }
   0x2   :  { %10 = vsyncpa [#allocation7], 0  ;;  %s15_s11 = sshll.u32 %s686_s0, 4  ;;  %s487_s12 = smov [#allocation2]   ;;  %s16_s11 = int_to_ptr.hbm [resolvable:$true] %s15_s11 }
   0x3   :  { %s17_s13 = sshll.u32 %s487_s12, 4  ;;  %s488_s14 = smov 128   ;;  %s18_s13 = int_to_ptr.vmem [resolvable:$true] %s17_s13 }
   0x4   :  { %s489_s15 = smov 8  }
   0x5   :  { %23 = dma.hbm_to_vmem [thread:$0]  %s16_s11, 6400, %s18_s13, [#allocation3], %s488_s14, %s488_s14, %s489_s15  }
   0x6   :  { %481 = dma.done.wait [#allocation3], 6400  }
   0x7   :  { %482 = vsyncadd [#allocation3], 4294960896  ;;  %v44_v0 = vld [vmem:[#allocation2 + $0x80] sm:$0xff]  ;;  %v43_v1 = vld [vmem:[#allocation2 + $0x78] sm:$0xff]  ;;  %vm299_vm0 = vcmask 1040384   ;;  %vm301_vm1 = vcmask 1041408  }
   0x8   :  { %v510_v2 = vld [vmem:[#allocation2 + $0x100] sm:$0xff]  ;;  %47 = vmatpush.msra.mxu0 %v44_v0  ;;  %v513_v3 = vld [vmem:[#allocation2 + $0xf8] sm:$0xff]  ;;  %v42_v4 = vld [vmem:[#allocation2 + $0x70] sm:$0xff]  ;;  %vm303_vm2 = vcmask 1042432   ;;  %vm305_vm3 = vcmask 1043456   ;;  %vm307_vm4 = vcmask 1044480  }
   0x9   :  { %84 = vmatpush.msra.mxu1 %v510_v2  ;;  %v515_v5 = vld [vmem:[#allocation2 + $0xf0] sm:$0xff]  ;;  %106 = vmatpush.msra.mxu2 %v510_v2  ;;  %v41_v6 = vld [vmem:[#allocation2 + $0x68] sm:$0xff]  ;;  %v40_v8 = vld [vmem:[#allocation2 + $0x60] sm:$0xff]  ;;  %vm309_vm5 = vcmask 1045504   ;;  %vm311_vm6 = vcmask 1046528   ;;  %s490_s0 = smov [#allocation6]  }
   0xa   :  { %134 = vmatpush.msra.mxu3 %v510_v2  ;;  %48 = vmatpush.msra.mxu0 %v43_v1  ;;  %v520_v7 = vld [vmem:[#allocation2 + $0xe8] sm:$0xff]  ;;  %v525_v9 = vld [vmem:[#allocation2 + $0xe0] sm:$0xff]  ;;  %v39_v10 = vld [vmem:[#allocation2 + $0x58] sm:$0xff]  ;;  %s369_s16 = sshll.u32 %s490_s0, 4  ;;  %s371_s19 = sshll.u32 %s688_s2, 4  ;;  %s370_s16 = int_to_ptr.vmem [resolvable:$true] %s369_s16  ;;  %s372_s19 = int_to_ptr.hbm [resolvable:$true] %s371_s19 }
   0xb   :  { %85 = vmatpush.msra.mxu1 %v513_v3  ;;  %107 = vmatpush.msra.mxu2 %v513_v3  ;;  %v530_v11 = vld [vmem:[#allocation2 + $0xd8] sm:$0xff]  ;;  %v38_v12 = vld [vmem:[#allocation2 + $0x50] sm:$0xff]  ;;  %v37_v14 = vld [vmem:[#allocation2 + $0x48] sm:$0xff]  ;;  %s491_s20 = smov [#allocation5]   ;;  %s360_s24 = sshll.u32 %s687_s1, 4  ;;  %s361_s24 = int_to_ptr.hbm [resolvable:$true] %s360_s24 }
   0xc   :  { %135 = vmatpush.msra.mxu3 %v513_v3  ;;  %49 = vmatpush.msra.mxu0 %v42_v4  ;;  %v535_v13 = vld [vmem:[#allocation2 + $0xd0] sm:$0xff]  ;;  %v540_v15 = vld [vmem:[#allocation2 + $0xc8] sm:$0xff]  ;;  %v36_v16 = vld [vmem:[#allocation2 + $0x40] sm:$0xff]  ;;  %s358_s21 = sshll.u32 %s491_s20, 4  ;;  %s359_s21 = int_to_ptr.vmem [resolvable:$true] %s358_s21 }
   0xd   :  { %86 = vmatpush.msra.mxu1 %v515_v5  ;;  %108 = vmatpush.msra.mxu2 %v515_v5  ;;  %v545_v17 = vld [vmem:[#allocation2 + $0xc0] sm:$0xff]  ;;  %v35_v18 = vld [vmem:[#allocation2 + $0x38] sm:$0xff]  ;;  %v34_v20 = vld [vmem:[#allocation2 + $0x30] sm:$0xff] }
   0xe   :  { %136 = vmatpush.msra.mxu3 %v515_v5  ;;  %50 = vmatpush.msra.mxu0 %v41_v6  ;;  %v550_v19 = vld [vmem:[#allocation2 + $0xb8] sm:$0xff]  ;;  %v555_v21 = vld [vmem:[#allocation2 + $0xb0] sm:$0xff]  ;;  %v33_v22 = vld [vmem:[#allocation2 + $0x28] sm:$0xff] }
   0xf   :  { %87 = vmatpush.msra.mxu1 %v520_v7  ;;  %109 = vmatpush.msra.mxu2 %v520_v7  ;;  %v560_v23 = vld [vmem:[#allocation2 + $0xa8] sm:$0xff]  ;;  %v32_v24 = vld [vmem:[#allocation2 + $0x20] sm:$0xff]  ;;  %v31_v26 = vld [vmem:[#allocation2 + $0x18] sm:$0xff] }
  0x10   :  { %137 = vmatpush.msra.mxu3 %v520_v7  ;;  %51 = vmatpush.msra.mxu0 %v40_v8  ;;  %v565_v25 = vld [vmem:[#allocation2 + $0xa0] sm:$0xff]  ;;  %v570_v27 = vld [vmem:[#allocation2 + $0x98] sm:$0xff]  ;;  %v30_v28 = vld [vmem:[#allocation2 + $0x10] sm:$0xff] }
  0x11   :  { %88 = vmatpush.msra.mxu1 %v525_v9  ;;  %110 = vmatpush.msra.mxu2 %v525_v9  ;;  %v575_v29 = vld [vmem:[#allocation2 + $0x90] sm:$0xff]  ;;  %v29_v30 = vld [vmem:[#allocation2 + $0x8] sm:$0xff]  ;;  %v28_v32 = vld [vmem:[#allocation2] sm:$0xff] }
  0x12   :  { %138 = vmatpush.msra.mxu3 %v525_v9  ;;  %52 = vmatpush.msra.mxu0 %v39_v10  ;;  %v580_v31 = vld [vmem:[#allocation2 + $0x88] sm:$0xff]  ;;  %v328_v6 = vld [vmem:[#allocation2 + $0x180] sm:$0xff]  ;;  %v326_v8 = vld [vmem:[#allocation2 + $0x170] sm:$0xff] }
  0x13   :  { %89 = vmatpush.msra.mxu1 %v530_v11  ;;  %111 = vmatpush.msra.mxu2 %v530_v11  ;;  %v83_v33 = vld [vmem:[#allocation2 + $0x18a] sm:$0x1]  ;;  %v391_v34 = vld [vmem:[#allocation2 + $0x188] ss:$0 sm:$0xff]  ;;  %v324_v10 = vld [vmem:[#allocation2 + $0x160] sm:$0xff] }
  0x14   :  { %139 = vmatpush.msra.mxu3 %v530_v11  ;;  %53 = vmatpush.msra.mxu0 %v38_v12  ;;  %v322_v12 = vld [vmem:[#allocation2 + $0x150] sm:$0xff] }
  0x15   :  { %90 = vmatpush.msra.mxu1 %v535_v13  ;;  %112 = vmatpush.msra.mxu2 %v535_v13 }
  0x16   :  { %140 = vmatpush.msra.mxu3 %v535_v13  ;;  %54 = vmatpush.msra.mxu0 %v37_v14  ;;  %v320_v14 = vld [vmem:[#allocation2 + $0x140] sm:$0xff] }
  0x17   :  { %91 = vmatpush.msra.mxu1 %v540_v15  ;;  %113 = vmatpush.msra.mxu2 %v540_v15 }
  0x18   :  { %141 = vmatpush.msra.mxu3 %v540_v15  ;;  %55 = vmatpush.msra.mxu0 %v36_v16 }
  0x19   :  { %92 = vmatpush.msra.mxu1 %v545_v17  ;;  %114 = vmatpush.msra.mxu2 %v545_v17 }
  0x1a   :  { %142 = vmatpush.msra.mxu3 %v545_v17  ;;  %56 = vmatpush.msra.mxu0 %v35_v18 }
  0x1b   :  { %93 = vmatpush.msra.mxu1 %v550_v19  ;;  %115 = vmatpush.msra.mxu2 %v550_v19 }
  0x1c   :  { %143 = vmatpush.msra.mxu3 %v550_v19  ;;  %57 = vmatpush.msra.mxu0 %v34_v20 }
  0x1d   :  { %94 = vmatpush.msra.mxu1 %v555_v21  ;;  %116 = vmatpush.msra.mxu2 %v555_v21 }
  0x1e   :  { %144 = vmatpush.msra.mxu3 %v555_v21  ;;  %58 = vmatpush.msra.mxu0 %v33_v22  ;;  %v318_v22 = vld [vmem:[#allocation2 + $0x130] sm:$0xff] }
  0x1f   :  { %95 = vmatpush.msra.mxu1 %v560_v23  ;;  %117 = vmatpush.msra.mxu2 %v560_v23 }
  0x20   :  { %145 = vmatpush.msra.mxu3 %v560_v23  ;;  %59 = vmatpush.msra.mxu0 %v32_v24  ;;  %v316_v24 = vld [vmem:[#allocation2 + $0x120] sm:$0xff] }
  0x21   :  { %96 = vmatpush.msra.mxu1 %v565_v25  ;;  %118 = vmatpush.msra.mxu2 %v565_v25 }
  0x22   :  { %146 = vmatpush.msra.mxu3 %v565_v25  ;;  %60 = vmatpush.msra.mxu0 %v31_v26  ;;  %v314_v26 = vld [vmem:[#allocation2 + $0x110] sm:$0xff] }
  0x23   :  { %97 = vmatpush.msra.mxu1 %v570_v27  ;;  %119 = vmatpush.msra.mxu2 %v570_v27 }
  0x24   :  { %147 = vmatpush.msra.mxu3 %v570_v27  ;;  %61 = vmatpush.msra.mxu0 %v30_v28 }
  0x25   :  { %98 = vmatpush.msra.mxu1 %v575_v29  ;;  %120 = vmatpush.msra.mxu2 %v575_v29 }
  0x26   :  { %148 = vmatpush.msra.mxu3 %v575_v29  ;;  %62 = vmatpush.msra.mxu0 %v29_v30 }
  0x27   :  { %99 = vmatpush.msra.mxu1 %v580_v31  ;;  %63 = vmatmul.f32.vlgmr.msra.gmra.mxu0 %v28_v32 }
  0x28   :  { %100 = vmatmul.f32.vlgmr.msra.gmra.mxu1 %v83_v33  ;;  %121 = vmatpush.msra.mxu2 %v580_v31  ;;  %v392_v33 = vld [vmem:[#allocation2 + $0x189] ss:$0 sm:$0xff] }
  0x29   :  { %149 = vmatpush.msra.mxu3 %v580_v31  ;;  %162 = vmatpush.msrb.mxu0 %v510_v2 }
  0x2a   :  { %190 = vmatpush.msrb.mxu1 %v510_v2  ;;  %218 = vmatpush.msrb.mxu2 %v510_v2 }
  0x2b   :  { %246 = vmatpush.msrb.mxu3 %v510_v2  ;;  %163 = vmatpush.msrb.mxu0 %v513_v3 }
  0x2c   :  { %191 = vmatpush.msrb.mxu1 %v513_v3  ;;  %219 = vmatpush.msrb.mxu2 %v513_v3 }
  0x2d   :  { %247 = vmatpush.msrb.mxu3 %v513_v3  ;;  %164 = vmatpush.msrb.mxu0 %v515_v5 }
  0x2e   :  { %192 = vmatpush.msrb.mxu1 %v515_v5  ;;  %220 = vmatpush.msrb.mxu2 %v515_v5 }
  0x2f   :  { %248 = vmatpush.msrb.mxu3 %v515_v5  ;;  %165 = vmatpush.msrb.mxu0 %v520_v7 }
  0x30   :  { %193 = vmatpush.msrb.mxu1 %v520_v7  ;;  %221 = vmatpush.msrb.mxu2 %v520_v7 }
  0x31   :  { %249 = vmatpush.msrb.mxu3 %v520_v7  ;;  %166 = vmatpush.msrb.mxu0 %v525_v9 }
  0x32   :  { %194 = vmatpush.msrb.mxu1 %v525_v9  ;;  %222 = vmatpush.msrb.mxu2 %v525_v9 }
  0x33   :  { %250 = vmatpush.msrb.mxu3 %v525_v9  ;;  %167 = vmatpush.msrb.mxu0 %v530_v11 }
  0x34   :  { %195 = vmatpush.msrb.mxu1 %v530_v11  ;;  %223 = vmatpush.msrb.mxu2 %v530_v11 }
  0x35   :  { %251 = vmatpush.msrb.mxu3 %v530_v11  ;;  %168 = vmatpush.msrb.mxu0 %v535_v13 }
  0x36   :  { %196 = vmatpush.msrb.mxu1 %v535_v13  ;;  %224 = vmatpush.msrb.mxu2 %v535_v13 }
  0x37   :  { %252 = vmatpush.msrb.mxu3 %v535_v13  ;;  %169 = vmatpush.msrb.mxu0 %v540_v15 }
  0x38   :  { %197 = vmatpush.msrb.mxu1 %v540_v15  ;;  %225 = vmatpush.msrb.mxu2 %v540_v15 }
  0x39   :  { %253 = vmatpush.msrb.mxu3 %v540_v15  ;;  %170 = vmatpush.msrb.mxu0 %v545_v17 }
  0x3a   :  { %198 = vmatpush.msrb.mxu1 %v545_v17  ;;  %226 = vmatpush.msrb.mxu2 %v545_v17 }
  0x3b   :  { %254 = vmatpush.msrb.mxu3 %v545_v17  ;;  %171 = vmatpush.msrb.mxu0 %v550_v19 }
  0x3c   :  { %199 = vmatpush.msrb.mxu1 %v550_v19  ;;  %227 = vmatpush.msrb.mxu2 %v550_v19 }
  0x3d   :  { %255 = vmatpush.msrb.mxu3 %v550_v19  ;;  %172 = vmatpush.msrb.mxu0 %v555_v21 }
  0x3e   :  { %200 = vmatpush.msrb.mxu1 %v555_v21  ;;  %228 = vmatpush.msrb.mxu2 %v555_v21 }
  0x3f   :  { %256 = vmatpush.msrb.mxu3 %v555_v21  ;;  %173 = vmatpush.msrb.mxu0 %v560_v23 }
  0x40   :  { %201 = vmatpush.msrb.mxu1 %v560_v23  ;;  %229 = vmatpush.msrb.mxu2 %v560_v23 }
  0x41   :  { %257 = vmatpush.msrb.mxu3 %v560_v23  ;;  %174 = vmatpush.msrb.mxu0 %v565_v25 }
  0x42   :  { %202 = vmatpush.msrb.mxu1 %v565_v25  ;;  %230 = vmatpush.msrb.mxu2 %v565_v25 }
  0x43   :  { %258 = vmatpush.msrb.mxu3 %v565_v25  ;;  %175 = vmatpush.msrb.mxu0 %v570_v27 }
  0x44   :  { %203 = vmatpush.msrb.mxu1 %v570_v27  ;;  %231 = vmatpush.msrb.mxu2 %v570_v27 }
  0x45   :  { %259 = vmatpush.msrb.mxu3 %v570_v27  ;;  %176 = vmatpush.msrb.mxu0 %v575_v29 }
  0x46   :  { %204 = vmatpush.msrb.mxu1 %v575_v29  ;;  %232 = vmatpush.msrb.mxu2 %v575_v29 }
  0x47   :  { %260 = vmatpush.msrb.mxu3 %v575_v29  ;;  %177 = vmatpush.msrb.mxu0 %v580_v31 }
  0x48   :  { %205 = vmatpush.msrb.mxu1 %v580_v31  ;;  %233 = vmatpush.msrb.mxu2 %v580_v31 }
  0x49   :  { %261 = vmatpush.msrb.mxu3 %v580_v31  ;;  %274 = vmatpush.msra.mxu0 %v510_v2 }
  0x4a   :  { %331 = vmatpush.msra.mxu1 %v328_v6 }
  0x4b   :  { %275 = vmatpush.msra.mxu0 %v513_v3 }
  0x4d   :  { %276 = vmatpush.msra.mxu0 %v515_v5 }
  0x4f   :  { %277 = vmatpush.msra.mxu0 %v520_v7  ;;  %v327_v7 = vld [vmem:[#allocation2 + $0x178] sm:$0xff] }
  0x50   :  { %332 = vmatpush.msra.mxu1 %v327_v7 }
  0x51   :  { %278 = vmatpush.msra.mxu0 %v525_v9  ;;  %v325_v9 = vld [vmem:[#allocation2 + $0x168] sm:$0xff] }
  0x52   :  { %333 = vmatpush.msra.mxu1 %v326_v8 }
  0x53   :  { %279 = vmatpush.msra.mxu0 %v530_v11  ;;  %v323_v11 = vld [vmem:[#allocation2 + $0x158] sm:$0xff] }
  0x54   :  { %334 = vmatpush.msra.mxu1 %v325_v9 }
  0x55   :  { %280 = vmatpush.msra.mxu0 %v535_v13  ;;  %v321_v13 = vld [vmem:[#allocation2 + $0x148] sm:$0xff] }
  0x56   :  { %335 = vmatpush.msra.mxu1 %v324_v10 }
  0x57   :  { %281 = vmatpush.msra.mxu0 %v540_v15 }
  0x58   :  { %336 = vmatpush.msra.mxu1 %v323_v11 }
  0x59   :  { %282 = vmatpush.msra.mxu0 %v545_v17 }
  0x5a   :  { %337 = vmatpush.msra.mxu1 %v322_v12 }
  0x5b   :  { %283 = vmatpush.msra.mxu0 %v550_v19 }
  0x5c   :  { %338 = vmatpush.msra.mxu1 %v321_v13 }
  0x5d   :  { %284 = vmatpush.msra.mxu0 %v555_v21  ;;  %v319_v21 = vld [vmem:[#allocation2 + $0x138] sm:$0xff] }
  0x5e   :  { %339 = vmatpush.msra.mxu1 %v320_v14 }
  0x5f   :  { %285 = vmatpush.msra.mxu0 %v560_v23  ;;  %v317_v23 = vld [vmem:[#allocation2 + $0x128] sm:$0xff] }
  0x60   :  { %340 = vmatpush.msra.mxu1 %v319_v21 }
  0x61   :  { %286 = vmatpush.msra.mxu0 %v565_v25  ;;  %v315_v25 = vld [vmem:[#allocation2 + $0x118] sm:$0xff] }
  0x62   :  { %341 = vmatpush.msra.mxu1 %v318_v22 }
  0x63   :  { %287 = vmatpush.msra.mxu0 %v570_v27  ;;  %v313_v27 = vld [vmem:[#allocation2 + $0x108] sm:$0xff] }
  0x64   :  { %342 = vmatpush.msra.mxu1 %v317_v23 }
  0x65   :  { %288 = vmatpush.msra.mxu0 %v575_v29 }
  0x66   :  { %343 = vmatpush.msra.mxu1 %v316_v24 }
  0x67   :  { %289 = vmatpush.msra.mxu0 %v580_v31 }
  0x68   :  { %344 = vmatpush.msra.mxu1 %v315_v25 }
  0x6a   :  { %345 = vmatpush.msra.mxu1 %v314_v26 }
  0x6c   :  { %346 = vmatpush.msra.mxu1 %v313_v27 }
  0xa4   :  { %v64_v35 = vpop.f32.mrf.mxu0 }
  0xa5   :  { %v101_v36 = vpop.f32.mrf.mxu1  ;;  %v670_v37 = vadd.f32 %v391_v34, %v64_v35 }
  0xa7   :  { %v104_v38 = vadd.f32 %v101_v36, %v670_v37 }
  0xa9   :  { %393 = vtanh.f32 %v104_v38 }
  0xaf   :  { %v394_v39 = vpop.eup %393 }
  0xb0   :  { %122 = vmatmul.f32.vlgmr.msra.gmra.mxu2 %v394_v39 }
 0x133   :  { %v123_v40 = vpop.f32.mrf.mxu2 }
 0x134   :  { %v127_v41 = vrot.slane %v123_v40, 7 }
 0x136   :  { %v129_v42 = vadd.f32 %v127_v41, %v670_v37 }
 0x138   :  { %395 = vtanh.f32 %v129_v42 }
 0x13e   :  { %v396_v43 = vpop.eup %395 }
 0x13f   :  { %v132_v44 = vrot.slane %v396_v43, 1  ;;  %v300_v49 = vsel %vm299_vm0, %v394_v39, %v396_v43 }
 0x141   :  { %150 = vmatmul.f32.vlgmr.msra.gmra.mxu3 %v132_v44 }
 0x1c4   :  { %v151_v45 = vpop.f32.mrf.mxu3 }
 0x1c5   :  { %v155_v46 = vrot.slane %v151_v45, 6 }
 0x1c7   :  { %v157_v47 = vadd.f32 %v155_v46, %v670_v37 }
 0x1c9   :  { %397 = vtanh.f32 %v157_v47 }
 0x1cf   :  { %v398_v48 = vpop.eup %397 }
 0x1d0   :  { %v160_v50 = vrot.slane %v398_v48, 2  ;;  %v302_v51 = vsel %vm301_vm1, %v300_v49, %v398_v48 }
 0x1d2   :  { %178 = vmatmul.f32.vlgmr.msrb.gmra.mxu0 %v160_v50 }
 0x24f   :  { %v179_v52 = vpop.f32.mrf.mxu0 }
 0x250   :  { %v183_v53 = vrot.slane %v179_v52, 5 }
 0x252   :  { %v185_v54 = vadd.f32 %v183_v53, %v670_v37 }
 0x254   :  { %399 = vtanh.f32 %v185_v54 }
 0x25a   :  { %v400_v55 = vpop.eup %399 }
 0x25b   :  { %v188_v56 = vrot.slane %v400_v55, 3  ;;  %v304_v57 = vsel %vm303_vm2, %v302_v51, %v400_v55 }
 0x25d   :  { %206 = vmatmul.f32.vlgmr.msrb.gmra.mxu1 %v188_v56 }
 0x2da   :  { %v207_v58 = vpop.f32.mrf.mxu1 }
 0x2db   :  { %v211_v59 = vrot.slane %v207_v58, 4 }
 0x2dd   :  { %v213_v60 = vadd.f32 %v211_v59, %v670_v37 }
 0x2df   :  { %401 = vtanh.f32 %v213_v60 }
 0x2e5   :  { %v402_v61 = vpop.eup %401 }
 0x2e6   :  { %v216_v62 = vrot.slane %v402_v61, 4  ;;  %v306_v63 = vsel %vm305_vm3, %v304_v57, %v402_v61 }
 0x2e8   :  { %234 = vmatmul.f32.vlgmr.msrb.gmra.mxu2 %v216_v62 }
 0x36b   :  { %v235_v0 = vpop.f32.mrf.mxu2 }
 0x36c   :  { %v239_v1 = vrot.slane %v235_v0, 3 }
 0x36e   :  { %v241_v2 = vadd.f32 %v239_v1, %v670_v37 }
 0x370   :  { %403 = vtanh.f32 %v241_v2 }
 0x376   :  { %v404_v3 = vpop.eup %403 }
 0x377   :  { %v244_v4 = vrot.slane %v404_v3, 5  ;;  %v308_v5 = vsel %vm307_vm4, %v306_v63, %v404_v3 }
 0x379   :  { %262 = vmatmul.f32.vlgmr.msrb.gmra.mxu3 %v244_v4 }
 0x3fc   :  { %v263_v15 = vpop.f32.mrf.mxu3 }
 0x3fd   :  { %v267_v16 = vrot.slane %v263_v15, 2 }
 0x3ff   :  { %v269_v17 = vadd.f32 %v267_v16, %v670_v37 }
 0x401   :  { %405 = vtanh.f32 %v269_v17 }
 0x407   :  { %v406_v18 = vpop.eup %405 }
 0x408   :  { %v272_v19 = vrot.slane %v406_v18, 6  ;;  %v310_v20 = vsel %vm309_vm5, %v308_v5, %v406_v18 }
 0x40a   :  { %290 = vmatmul.f32.vlgmr.msra.gmra.mxu0 %v272_v19 }
 0x487   :  { %v291_v28 = vpop.f32.mrf.mxu0 }
 0x488   :  { %v295_v29 = vrot.slane %v291_v28, 1 }
 0x48a   :  { %v297_v30 = vadd.f32 %v295_v29, %v670_v37 }
 0x48c   :  { %407 = vtanh.f32 %v297_v30 }
 0x492   :  { %v408_v31 = vpop.eup %407 }
 0x493   :  { %352 = vst [vmem:[#allocation6 - $0x7] sm:$0x80] %v408_v31  ;;  %v312_v32 = vsel %vm311_vm6, %v310_v20, %v408_v31 }
 0x494   :  { %347 = vmatmul.f32.vlgmr.msra.gmra.mxu1 %v312_v32  ;;  %374 = dma.vmem_to_hbm [thread:$0]  %s370_s16, 16, %s372_s19, [#allocation7]  }
 0x511   :  { %v348_v34 = vpop.f32.mrf.mxu1 }
 0x512   :  { %v349_v35 = vadd.f32 %v392_v33, %v348_v34 }
 0x514   :  { %351 = vst [vmem:[#allocation5] sm:$0xff] %v349_v35 }
 0x515   :  { %363 = dma.vmem_to_hbm [thread:$0]  %s359_s21, 128, %s361_s24, [#allocation4]  }
 0x516   :  { %483 = dma.done.wait [#allocation4], 128  }
 0x517   :  { %484 = vsyncadd [#allocation4], 4294967168 }
 0x518   :  { %485 = dma.done.wait [#allocation7], 16  }
 0x519   :  { %486 = vsyncadd [#allocation7], 4294967280 }
 0x51a   :  { %383 = vsyncpa [#allocation3], 1 }
 0x51b   :  { %384 = vsyncpa [#allocation4], 1 }
 0x51c   :  { %385 = vsyncpa [#allocation7], 1 }

</bundles_post_ra>
